<compile_context>
chip_gen: v7x
topology: tpu7x:2x2x1
jax: 0.10.0
libtpu: 0.0.40
codegen_flags: <defaults>
</compile_context>

<pallas_src>
import jax
import jax.numpy as jnp
from jax.experimental import pallas as pl
from jax.experimental.pallas import tpu as pltpu


def _round_up(x: int, m: int) -> int:
    return ((x + m - 1) // m) * m


def _make_kernel(num_actions: int):
    """Kernel closure; `num_actions` is the *unpadded* action count (static)."""

    def kernel(act_ref, hs_ref,
               w1h_ref, w1a_ref, b1_ref, w2_ref, b2_ref,
               w3_ref, b3_ref, w4_ref, b4_ref,
               h_out_ref, r_out_ref):
        hs = hs_ref[...]                       # (tb, Hp) f32, zero-padded lanes
        act = act_ref[...]                     # (tb, 1)  int32
        tb = hs.shape[0]

        # ---- contribution of one-hot(action) through W1's action rows ----------
        w1a = w1a_ref[...]                     # (Ap, Pp) f32, padded rows are zero
        if num_actions <= 32:
            # Direct row select on the VPU: no MXU pass, no materialized one-hot.
            act_w = (act == 0).astype(jnp.float32) * w1a[0][None, :]
            for a in range(1, num_actions):
                act_w = act_w + (act == a).astype(jnp.float32) * w1a[a][None, :]
        else:
            # Large action spaces: bf16 one-hot matmul fallback (f32 accumulation).
            a_pad = w1a.shape[0]
            lane = jax.lax.broadcasted_iota(jnp.int32, (tb, a_pad), 1)
            onehot = (lane == act).astype(jnp.bfloat16)
            act_w = jnp.dot(onehot, w1a.astype(jnp.bfloat16),
                            preferred_element_type=jnp.float32)

        # ---- transition_net: Linear(hidden+actions -> planes), ReLU, Linear ----
        t = jnp.dot(hs.astype(jnp.bfloat16), w1h_ref[...],
                    preferred_element_type=jnp.float32)
        t = jnp.maximum(t + act_w + b1_ref[...], 0.0)
        h_new = jnp.dot(t.astype(jnp.bfloat16), w2_ref[...],
                        preferred_element_type=jnp.float32) + b2_ref[...]

        # ---- reward_net(h_new): Linear(hidden -> planes), ReLU, Linear ---------
        r = jnp.dot(h_new.astype(jnp.bfloat16), w3_ref[...],
                    preferred_element_type=jnp.float32) + b3_ref[...]
        r = jnp.maximum(r, 0.0)
        r = jnp.dot(r.astype(jnp.bfloat16), w4_ref[...],
                    preferred_element_type=jnp.float32) + b4_ref[...]

        h_out_ref[...] = h_new.astype(h_out_ref.dtype)
        r_out_ref[...] = r.astype(r_out_ref.dtype)

    return kernel


def prepare_params(params):
    """One-time prep: zero-pad feature dims to multiples of 128, cast weights bf16."""
    hidden_dim, num_planes = params["w1h"].shape
    num_actions = params["w1a"].shape[0]
    support_size = params["w4"].shape[1]
    hp = _round_up(hidden_dim, 128)
    pp = _round_up(num_planes, 128)
    sp = _round_up(support_size, 128)
    ap = _round_up(num_actions, 8)

    def pad2(x, rows, cols):
        return jnp.pad(x, ((0, rows - x.shape[0]), (0, cols - x.shape[1])))

    prepped = {
        "w1h": pad2(params["w1h"], hp, pp).astype(jnp.bfloat16),
        "w1a": pad2(params["w1a"], ap, pp).astype(jnp.float32),  # VPU row-selected
        "b1":  pad2(params["b1"], 1, pp).astype(jnp.float32),
        "w2":  pad2(params["w2"], pp, hp).astype(jnp.bfloat16),
        "b2":  pad2(params["b2"], 1, hp).astype(jnp.float32),
        "w3":  pad2(params["w3"], hp, pp).astype(jnp.bfloat16),
        "b3":  pad2(params["b3"], 1, pp).astype(jnp.float32),
        "w4":  pad2(params["w4"], pp, sp).astype(jnp.bfloat16),
        "b4":  pad2(params["b4"], 1, sp).astype(jnp.float32),
    }
    dims = {"hidden_dim": hidden_dim, "num_actions": num_actions,
            "num_planes": num_planes, "support_size": support_size}
    return prepped, dims


def dynamics_mlp(hidden_state, action, prepped, dims):
    """Fused forward.  hidden_state: (B, hidden_dim) f32, action: (B, 1) or (B,) int."""
    B, hidden_dim = hidden_state.shape
    num_actions = dims["num_actions"]
    support_size = dims["support_size"]
    hp, pp = prepped["w1h"].shape
    sp = prepped["w4"].shape[1]

    # ---- batch tiling under a generation-aware VMEM budget -----------------------
    try:
        phys_vmem = int(pltpu.get_tpu_info().vmem_capacity_bytes)
    except Exception:
        phys_vmem = 64 * 1024 * 1024          # v7x per-TC size (most restrictive)

    weight_bytes = sum(int(v.size) * v.dtype.itemsize for v in prepped.values())
    per_row_bytes = 4 * (2 * hp + sp) + 512   # hs + h_out + r_out (+ action slack)
    budget = min((phys_vmem * 3) // 4, 96 * 1024 * 1024)
    avail = max(budget - 2 * weight_bytes - (2 << 20), 16 * per_row_bytes)
    row_cap = max(8, min(1024, (avail // (2 * per_row_bytes)) // 8 * 8))

    bp0 = _round_up(B, 8)
    grid_n = max(1, -(-bp0 // row_cap))
    if grid_n == 1 and bp0 >= 256:
        grid_n = 2                            # give v7x's 2nd TensorCore a 'parallel' step
    tb = _round_up(-(-bp0 // grid_n), 8)
    bp = grid_n * tb

    vmem_limit = int(min(max(2 * weight_bytes + 2 * tb * per_row_bytes + (4 << 20),
                             16 * 1024 * 1024),
                         (phys_vmem * 9) // 10))

    # ---- pad inputs (zero rows / zero lanes are exact no-ops, sliced off below) --
    hs_p = jnp.pad(hidden_state.astype(jnp.float32),
                   ((0, bp - B), (0, hp - hidden_dim)))
    act_p = jnp.pad(action.reshape(B, 1).astype(jnp.int32), ((0, bp - B), (0, 0)))

    def row_spec(shape):
        return pl.BlockSpec(shape, lambda i: (i, 0))

    def rep_spec(arr):
        return pl.BlockSpec(arr.shape, lambda i: (0, 0))

    in_specs = [
        row_spec((tb, 1)),                    # action
        row_spec((tb, hp)),                   # hidden_state
        rep_spec(prepped["w1h"]), rep_spec(prepped["w1a"]), rep_spec(prepped["b1"]),
        rep_spec(prepped["w2"]), rep_spec(prepped["b2"]),
        rep_spec(prepped["w3"]), rep_spec(prepped["b3"]),
        rep_spec(prepped["w4"]), rep_spec(prepped["b4"]),
    ]
    out_specs = (row_spec((tb, hp)), row_spec((tb, sp)))
    out_shape = (jax.ShapeDtypeStruct((bp, hp), jnp.float32),
                 jax.ShapeDtypeStruct((bp, sp), jnp.float32))

    flops = 2 * bp * (3 * hp * pp + pp * sp)
    bytes_accessed = weight_bytes + 4 * bp * (hp + 1) + 4 * bp * (hp + sp)

    h_pad, r_pad = pl.pallas_call(
        _make_kernel(num_actions),
        grid=(grid_n,),
        in_specs=in_specs,
        out_specs=out_specs,
        out_shape=out_shape,
        compiler_params=pltpu.CompilerParams(
            dimension_semantics=("parallel",),
            vmem_limit_bytes=vmem_limit),
        cost_estimate=pl.CostEstimate(flops=flops, transcendentals=0,
                                      bytes_accessed=bytes_accessed),
    )(act_p, hs_p,
      prepped["w1h"], prepped["w1a"], prepped["b1"],
      prepped["w2"], prepped["b2"],
      prepped["w3"], prepped["b3"],
      prepped["w4"], prepped["b4"])

    return h_pad[:B, :hidden_dim], r_pad[:B, :support_size]


def init_params(key, num_actions, num_planes, hidden_dim, support_size):
    """Synthetic params, stored (in, out) i.e. transposed vs. torch's (out, in)."""
    ks = jax.random.split(key, 8)

    def linear(kw, kb, fan_in, fan_out):
        bound = 1.0 / (fan_in ** 0.5)
        w = jax.random.uniform(kw, (fan_in, fan_out), jnp.float32, -bound, bound)
        b = jax.random.uniform(kb, (1, fan_out), jnp.float32, -bound, bound)
        return w, b

    w1, b1 = linear(ks[0], ks[1], hidden_dim + num_actions, num_planes)
    w2, b2 = linear(ks[2], ks[3], num_planes, hidden_dim)
    w3, b3 = linear(ks[4], ks[5], hidden_dim, num_planes)
    w4, b4 = linear(ks[6], ks[7], num_planes, support_size)
    return {"w1h": w1[:hidden_dim], "w1a": w1[hidden_dim:], "b1": b1,
            "w2": w2, "b2": b2, "w3": w3, "b3": b3, "w4": w4, "b4": b4}


if __name__ == "__main__":
    B = 2
    hidden_dim = 32
    num_actions = 4
    num_planes = 64
    support_size = 32

    key = jax.random.PRNGKey(0)
    kh, ka, kp = jax.random.split(key, 3)
    hidden_state = jax.random.normal(kh, (B, hidden_dim), jnp.float32)
    action = jax.random.randint(ka, (B, 1), 0, num_actions, dtype=jnp.int32)
    params = init_params(kp, num_actions, num_planes, hidden_dim, support_size)
    prepped, dims = prepare_params(params)

    fwd = jax.jit(lambda h, a: dynamics_mlp(h, a, prepped, dims))
    h_new, reward_logits = fwd(hidden_state, action)
    jax.block_until_ready((h_new, reward_logits))

    # Pure-JAX f32 reference of the PyTorch forward (one-hot -> concat -> two MLPs).
    onehot = jax.nn.one_hot(action[:, 0], num_actions, dtype=jnp.float32)
    x = jnp.concatenate([hidden_state, onehot], axis=1)
    w1 = jnp.concatenate([params["w1h"], params["w1a"]], axis=0)
    t = jnp.maximum(x @ w1 + params["b1"], 0.0)
    h_ref = t @ params["w2"] + params["b2"]
    r = jnp.maximum(h_ref @ params["w3"] + params["b3"], 0.0)
    r_ref = r @ params["w4"] + params["b4"]

    assert h_new.shape == (B, hidden_dim)
    assert reward_logits.shape == (B, support_size)
    # bf16 MXU operands (f32 accumulation) -> relaxed tolerance vs the pure-f32 ref.
    assert bool(jnp.allclose(h_new, h_ref, atol=3e-2, rtol=3e-2))
    assert bool(jnp.allclose(reward_logits, r_ref, atol=3e-2, rtol=3e-2))
    print("KERNEL_OK")
</pallas_src>

<mosaic_0001>
module attributes {stable_mosaic.version = 11 : i64} {
  func.func @kernel(%arg0: i32, %arg1: memref<8x1xi32, #tpu.memory_space<vmem>>, %arg2: memref<8x128xf32, #tpu.memory_space<vmem>>, %arg3: memref<128x128xbf16, #tpu.memory_space<vmem>>, %arg4: memref<8x128xf32, #tpu.memory_space<vmem>>, %arg5: memref<1x128xf32, #tpu.memory_space<vmem>>, %arg6: memref<128x128xbf16, #tpu.memory_space<vmem>>, %arg7: memref<1x128xf32, #tpu.memory_space<vmem>>, %arg8: memref<128x128xbf16, #tpu.memory_space<vmem>>, %arg9: memref<1x128xf32, #tpu.memory_space<vmem>>, %arg10: memref<128x128xbf16, #tpu.memory_space<vmem>>, %arg11: memref<1x128xf32, #tpu.memory_space<vmem>>, %arg12: memref<8x128xf32, #tpu.memory_space<vmem>>, %arg13: memref<8x128xf32, #tpu.memory_space<vmem>>) attributes {dimension_semantics = [#tpu.dimension_semantics<parallel>], iteration_bounds = array<i64: 1>, scalar_prefetch = 0 : i64, scratch_operands = 0 : i64, tpu.core_type = #tpu.core_type<tc>, window_params = [{transform_indices = @transform_0, window_bounds = array<i64: 8, 1>}, {transform_indices = @transform_1, window_bounds = array<i64: 8, 128>}, {pipeline_mode = #tpu.pipeline_mode<synchronous>, transform_indices = @transform_2, window_bounds = array<i64: 128, 128>}, {pipeline_mode = #tpu.pipeline_mode<synchronous>, transform_indices = @transform_3, window_bounds = array<i64: 8, 128>}, {pipeline_mode = #tpu.pipeline_mode<synchronous>, transform_indices = @transform_4, window_bounds = array<i64: 1, 128>}, {pipeline_mode = #tpu.pipeline_mode<synchronous>, transform_indices = @transform_5, window_bounds = array<i64: 128, 128>}, {pipeline_mode = #tpu.pipeline_mode<synchronous>, transform_indices = @transform_6, window_bounds = array<i64: 1, 128>}, {pipeline_mode = #tpu.pipeline_mode<synchronous>, transform_indices = @transform_7, window_bounds = array<i64: 128, 128>}, {pipeline_mode = #tpu.pipeline_mode<synchronous>, transform_indices = @transform_8, window_bounds = array<i64: 1, 128>}, {pipeline_mode = #tpu.pipeline_mode<synchronous>, transform_indices = @transform_9, window_bounds = array<i64: 128, 128>}, {pipeline_mode = #tpu.pipeline_mode<synchronous>, transform_indices = @transform_10, window_bounds = array<i64: 1, 128>}, {transform_indices = @transform_11, window_bounds = array<i64: 8, 128>}, {transform_indices = @transform_12, window_bounds = array<i64: 8, 128>}]} {
    %c0 = arith.constant 0 : index
    %c0_0 = arith.constant 0 : index
    %0 = vector.load %arg2[%c0, %c0_0] : memref<8x128xf32, #tpu.memory_space<vmem>>, vector<8x128xf32>
    %c0_1 = arith.constant 0 : index
    %c0_2 = arith.constant 0 : index
    %1 = vector.load %arg1[%c0_1, %c0_2] : memref<8x1xi32, #tpu.memory_space<vmem>>, vector<8x1xi32>
    %c0_3 = arith.constant 0 : index
    %c0_4 = arith.constant 0 : index
    %2 = vector.load %arg4[%c0_3, %c0_4] : memref<8x128xf32, #tpu.memory_space<vmem>>, vector<8x128xf32>
    %c0_i32 = arith.constant 0 : i32
    %3 = vector.broadcast %c0_i32 : i32 to vector<8x1xi32>
    %4 = arith.cmpi eq, %1, %3 : vector<8x1xi32>
    %5 = arith.extui %4 : vector<8x1xi1> to vector<8x1xi32>
    %6 = arith.sitofp %5 : vector<8x1xi32> to vector<8x1xf32>
    %7 = vector.extract_strided_slice %2 {offsets = [0, 0], sizes = [1, 128], strides = [1, 1]} : vector<8x128xf32> to vector<1x128xf32>
    %8 = vector.shape_cast %7 : vector<1x128xf32> to vector<128xf32>
    %9 = vector.shape_cast %8 : vector<128xf32> to vector<1x128xf32>
    %10 = vector.broadcast %6 : vector<8x1xf32> to vector<8x128xf32>
    %11 = vector.broadcast %9 : vector<1x128xf32> to vector<8x128xf32>
    %12 = arith.mulf %10, %11 : vector<8x128xf32>
    %c1_i32 = arith.constant 1 : i32
    %13 = vector.broadcast %c1_i32 : i32 to vector<8x1xi32>
    %14 = arith.cmpi eq, %1, %13 : vector<8x1xi32>
    %15 = arith.extui %14 : vector<8x1xi1> to vector<8x1xi32>
    %16 = arith.sitofp %15 : vector<8x1xi32> to vector<8x1xf32>
    %17 = vector.extract_strided_slice %2 {offsets = [1, 0], sizes = [1, 128], strides = [1, 1]} : vector<8x128xf32> to vector<1x128xf32>
    %18 = vector.shape_cast %17 : vector<1x128xf32> to vector<128xf32>
    %19 = vector.shape_cast %18 : vector<128xf32> to vector<1x128xf32>
    %20 = vector.broadcast %16 : vector<8x1xf32> to vector<8x128xf32>
    %21 = vector.broadcast %19 : vector<1x128xf32> to vector<8x128xf32>
    %22 = arith.mulf %20, %21 : vector<8x128xf32>
    %23 = arith.addf %12, %22 : vector<8x128xf32>
    %c2_i32 = arith.constant 2 : i32
    %24 = vector.broadcast %c2_i32 : i32 to vector<8x1xi32>
    %25 = arith.cmpi eq, %1, %24 : vector<8x1xi32>
    %26 = arith.extui %25 : vector<8x1xi1> to vector<8x1xi32>
    %27 = arith.sitofp %26 : vector<8x1xi32> to vector<8x1xf32>
    %28 = vector.extract_strided_slice %2 {offsets = [2, 0], sizes = [1, 128], strides = [1, 1]} : vector<8x128xf32> to vector<1x128xf32>
    %29 = vector.shape_cast %28 : vector<1x128xf32> to vector<128xf32>
    %30 = vector.shape_cast %29 : vector<128xf32> to vector<1x128xf32>
    %31 = vector.broadcast %27 : vector<8x1xf32> to vector<8x128xf32>
    %32 = vector.broadcast %30 : vector<1x128xf32> to vector<8x128xf32>
    %33 = arith.mulf %31, %32 : vector<8x128xf32>
    %34 = arith.addf %23, %33 : vector<8x128xf32>
    %c3_i32 = arith.constant 3 : i32
    %35 = vector.broadcast %c3_i32 : i32 to vector<8x1xi32>
    %36 = arith.cmpi eq, %1, %35 : vector<8x1xi32>
    %37 = arith.extui %36 : vector<8x1xi1> to vector<8x1xi32>
    %38 = arith.sitofp %37 : vector<8x1xi32> to vector<8x1xf32>
    %39 = vector.extract_strided_slice %2 {offsets = [3, 0], sizes = [1, 128], strides = [1, 1]} : vector<8x128xf32> to vector<1x128xf32>
    %40 = vector.shape_cast %39 : vector<1x128xf32> to vector<128xf32>
    %41 = vector.shape_cast %40 : vector<128xf32> to vector<1x128xf32>
    %42 = vector.broadcast %38 : vector<8x1xf32> to vector<8x128xf32>
    %43 = vector.broadcast %41 : vector<1x128xf32> to vector<8x128xf32>
    %44 = arith.mulf %42, %43 : vector<8x128xf32>
    %45 = arith.addf %34, %44 : vector<8x128xf32>
    %46 = arith.truncf %0 : vector<8x128xf32> to vector<8x128xbf16>
    %c0_5 = arith.constant 0 : index
    %c0_6 = arith.constant 0 : index
    %47 = vector.load %arg3[%c0_5, %c0_6] : memref<128x128xbf16, #tpu.memory_space<vmem>>, vector<128x128xbf16>
    %cst = arith.constant dense<0.000000e+00> : vector<8x128xf32>
    %48 = tpu.matmul %46, %47, %cst {dimension_numbers = #tpu.dot_dimension_numbers<[1], [0], [0], [1], [0, 0, 1, 1], [], []>} : vector<8x128xbf16>, vector<128x128xbf16>, vector<8x128xf32> -> vector<8x128xf32>
    %49 = arith.addf %48, %45 : vector<8x128xf32>
    %c0_7 = arith.constant 0 : index
    %c0_8 = arith.constant 0 : index
    %50 = vector.load %arg5[%c0_7, %c0_8] : memref<1x128xf32, #tpu.memory_space<vmem>>, vector<1x128xf32>
    %51 = vector.broadcast %50 : vector<1x128xf32> to vector<8x128xf32>
    %52 = arith.addf %49, %51 : vector<8x128xf32>
    %cst_9 = arith.constant 0.000000e+00 : f32
    %53 = vector.broadcast %cst_9 : f32 to vector<8x128xf32>
    %54 = arith.maximumf %52, %53 : vector<8x128xf32>
    %55 = arith.truncf %54 : vector<8x128xf32> to vector<8x128xbf16>
    %c0_10 = arith.constant 0 : index
    %c0_11 = arith.constant 0 : index
    %56 = vector.load %arg6[%c0_10, %c0_11] : memref<128x128xbf16, #tpu.memory_space<vmem>>, vector<128x128xbf16>
    %cst_12 = arith.constant dense<0.000000e+00> : vector<8x128xf32>
    %57 = tpu.matmul %55, %56, %cst_12 {dimension_numbers = #tpu.dot_dimension_numbers<[1], [0], [0], [1], [0, 0, 1, 1], [], []>} : vector<8x128xbf16>, vector<128x128xbf16>, vector<8x128xf32> -> vector<8x128xf32>
    %c0_13 = arith.constant 0 : index
    %c0_14 = arith.constant 0 : index
    %58 = vector.load %arg7[%c0_13, %c0_14] : memref<1x128xf32, #tpu.memory_space<vmem>>, vector<1x128xf32>
    %59 = vector.broadcast %58 : vector<1x128xf32> to vector<8x128xf32>
    %60 = arith.addf %57, %59 : vector<8x128xf32>
    %61 = arith.truncf %60 : vector<8x128xf32> to vector<8x128xbf16>
    %c0_15 = arith.constant 0 : index
    %c0_16 = arith.constant 0 : index
    %62 = vector.load %arg8[%c0_15, %c0_16] : memref<128x128xbf16, #tpu.memory_space<vmem>>, vector<128x128xbf16>
    %cst_17 = arith.constant dense<0.000000e+00> : vector<8x128xf32>
    %63 = tpu.matmul %61, %62, %cst_17 {dimension_numbers = #tpu.dot_dimension_numbers<[1], [0], [0], [1], [0, 0, 1, 1], [], []>} : vector<8x128xbf16>, vector<128x128xbf16>, vector<8x128xf32> -> vector<8x128xf32>
    %c0_18 = arith.constant 0 : index
    %c0_19 = arith.constant 0 : index
    %64 = vector.load %arg9[%c0_18, %c0_19] : memref<1x128xf32, #tpu.memory_space<vmem>>, vector<1x128xf32>
    %65 = vector.broadcast %64 : vector<1x128xf32> to vector<8x128xf32>
    %66 = arith.addf %63, %65 : vector<8x128xf32>
    %cst_20 = arith.constant 0.000000e+00 : f32
    %67 = vector.broadcast %cst_20 : f32 to vector<8x128xf32>
    %68 = arith.maximumf %66, %67 : vector<8x128xf32>
    %69 = arith.truncf %68 : vector<8x128xf32> to vector<8x128xbf16>
    %c0_21 = arith.constant 0 : index
    %c0_22 = arith.constant 0 : index
    %70 = vector.load %arg10[%c0_21, %c0_22] : memref<128x128xbf16, #tpu.memory_space<vmem>>, vector<128x128xbf16>
    %cst_23 = arith.constant dense<0.000000e+00> : vector<8x128xf32>
    %71 = tpu.matmul %69, %70, %cst_23 {dimension_numbers = #tpu.dot_dimension_numbers<[1], [0], [0], [1], [0, 0, 1, 1], [], []>} : vector<8x128xbf16>, vector<128x128xbf16>, vector<8x128xf32> -> vector<8x128xf32>
    %c0_24 = arith.constant 0 : index
    %c0_25 = arith.constant 0 : index
    %72 = vector.load %arg11[%c0_24, %c0_25] : memref<1x128xf32, #tpu.memory_space<vmem>>, vector<1x128xf32>
    %73 = vector.broadcast %72 : vector<1x128xf32> to vector<8x128xf32>
    %74 = arith.addf %71, %73 : vector<8x128xf32>
    %c0_26 = arith.constant 0 : index
    %c0_27 = arith.constant 0 : index
    %75 = vector.load %arg12[%c0_26, %c0_27] : memref<8x128xf32, #tpu.memory_space<vmem>>, vector<8x128xf32>
    tpu.vector_store %arg12[%c0_26, %c0_27], %60 {strides = array<i32>} : memref<8x128xf32, #tpu.memory_space<vmem>>, vector<8x128xf32>,
    %c0_28 = arith.constant 0 : index
    %c0_29 = arith.constant 0 : index
    %76 = vector.load %arg13[%c0_28, %c0_29] : memref<8x128xf32, #tpu.memory_space<vmem>>, vector<8x128xf32>
    tpu.vector_store %arg13[%c0_28, %c0_29], %74 {strides = array<i32>} : memref<8x128xf32, #tpu.memory_space<vmem>>, vector<8x128xf32>,
    return
  }
  func.func @transform_0(%arg0: i32) -> (i32, i32) {
    %c0_i32 = arith.constant 0 : i32
    %c0_i32_0 = arith.constant 0 : i32
    return %arg0, %c0_i32 : i32, i32
  }
  func.func @transform_1(%arg0: i32) -> (i32, i32) {
    %c0_i32 = arith.constant 0 : i32
    %c0_i32_0 = arith.constant 0 : i32
    return %arg0, %c0_i32 : i32, i32
  }
  func.func @transform_2(%arg0: i32) -> (i32, i32) {
    %c0_i32 = arith.constant 0 : i32
    %c0_i32_0 = arith.constant 0 : i32
    %c0_i32_1 = arith.constant 0 : i32
    return %c0_i32, %c0_i32_0 : i32, i32
  }
  func.func @transform_3(%arg0: i32) -> (i32, i32) {
    %c0_i32 = arith.constant 0 : i32
    %c0_i32_0 = arith.constant 0 : i32
    %c0_i32_1 = arith.constant 0 : i32
    return %c0_i32, %c0_i32_0 : i32, i32
  }
  func.func @transform_4(%arg0: i32) -> (i32, i32) {
    %c0_i32 = arith.constant 0 : i32
    %c0_i32_0 = arith.constant 0 : i32
    %c0_i32_1 = arith.constant 0 : i32
    return %c0_i32, %c0_i32_0 : i32, i32
  }
  func.func @transform_5(%arg0: i32) -> (i32, i32) {
    %c0_i32 = arith.constant 0 : i32
    %c0_i32_0 = arith.constant 0 : i32
    %c0_i32_1 = arith.constant 0 : i32
    return %c0_i32, %c0_i32_0 : i32, i32
  }
  func.func @transform_6(%arg0: i32) -> (i32, i32) {
    %c0_i32 = arith.constant 0 : i32
    %c0_i32_0 = arith.constant 0 : i32
    %c0_i32_1 = arith.constant 0 : i32
    return %c0_i32, %c0_i32_0 : i32, i32
  }
  func.func @transform_7(%arg0: i32) -> (i32, i32) {
    %c0_i32 = arith.constant 0 : i32
    %c0_i32_0 = arith.constant 0 : i32
    %c0_i32_1 = arith.constant 0 : i32
    return %c0_i32, %c0_i32_0 : i32, i32
  }
  func.func @transform_8(%arg0: i32) -> (i32, i32) {
    %c0_i32 = arith.constant 0 : i32
    %c0_i32_0 = arith.constant 0 : i32
    %c0_i32_1 = arith.constant 0 : i32
    return %c0_i32, %c0_i32_0 : i32, i32
  }
  func.func @transform_9(%arg0: i32) -> (i32, i32) {
    %c0_i32 = arith.constant 0 : i32
    %c0_i32_0 = arith.constant 0 : i32
    %c0_i32_1 = arith.constant 0 : i32
    return %c0_i32, %c0_i32_0 : i32, i32
  }
  func.func @transform_10(%arg0: i32) -> (i32, i32) {
    %c0_i32 = arith.constant 0 : i32
    %c0_i32_0 = arith.constant 0 : i32
    %c0_i32_1 = arith.constant 0 : i32
    return %c0_i32, %c0_i32_0 : i32, i32
  }
  func.func @transform_11(%arg0: i32) -> (i32, i32) {
    %c0_i32 = arith.constant 0 : i32
    %c0_i32_0 = arith.constant 0 : i32
    return %arg0, %c0_i32 : i32, i32
  }
  func.func @transform_12(%arg0: i32) -> (i32, i32) {
    %c0_i32 = arith.constant 0 : i32
    %c0_i32_0 = arith.constant 0 : i32
    return %arg0, %c0_i32 : i32, i32
  }
}

</mosaic_0001>

<bundles_post_ra>
// kernel: _lambda_.1
= control target key start
LH: loop header
LB: loop body
LE: loop exit
PB: predicated region body
PF: predicated region fallthrough
CT: control target
= control target key end

     0   :  { %18 = vsyncpa [#allocation3], 0  ;;  %s1096_s0 = inlined_call_operand.vmem [shape: s32[8,1], index: 0, kind: input, shape index: {}]   ;;  %s1097_s1 = inlined_call_operand.vmem [shape: f32[8,128], index: 1, kind: input, shape index: {}]   ;;  %s1098_s2 = inlined_call_operand.hbm [shape: bf16[128,128], index: 2, kind: input, shape index: {}]   ;;  %s1099_s3 = inlined_call_operand.vmem [shape: f32[8,128], index: 3, kind: input, shape index: {}]   ;;  %s1100_s4 = inlined_call_operand.vmem [shape: f32[1,128], index: 4, kind: input, shape index: {}]   ;;  %s1101_s5 = inlined_call_operand.hbm [shape: bf16[128,128], index: 5, kind: input, shape index: {}]   ;;  %s1102_s6 = inlined_call_operand.vmem [shape: f32[1,128], index: 6, kind: input, shape index: {}]   ;;  %s1103_s7 = inlined_call_operand.hbm [shape: bf16[128,128], index: 7, kind: input, shape index: {}]   ;;  %s1104_s8 = inlined_call_operand.vmem [shape: f32[1,128], index: 8, kind: input, shape index: {}]   ;;  %s1105_s9 = inlined_call_operand.vmem [shape: bf16[128,128], index: 9, kind: input, shape index: {}]   ;;  %s1106_s10 = inlined_call_operand.vmem [shape: f32[1,128], index: 10, kind: input, shape index: {}]   ;;  %s1107_s11 = inlined_call_operand.vmem [shape: f32[8,128], index: 11, kind: output, shape index: {0}]   ;;  %s1108_s12 = inlined_call_operand.vmem [shape: f32[8,128], index: 12, kind: output, shape index: {1}]  }
   0x1   :  { %19 = vsyncpa [#allocation5], 0  ;;  %s876_s21 = smov [#allocation4]   ;;  %s877_s23 = smov [#allocation2]  }
   0x2   :  { %s45_s22 = sshll.u32 %s876_s21, 4  ;;  %s29_s24 = sshll.u32 %s877_s23, 4  ;;  %s46_s22 = int_to_ptr.vmem [resolvable:$true] %s45_s22  ;;  %s949_s24 = int_to_ptr.vmem [resolvable:$true] %s29_s24 }
   0x3   :  { %s806_s27 = scalar_lea.hbm %s1101_s5, 1024 }
   0x4   :  { %p807_p0 = scmp.ne.s32.totalorder %s1101_s5, %s806_s27  ;;  %p810_p1 = scmp.lt.u32.totalorder %s806_s27, %s1101_s5 }
   0x6   :  { %p812_p2 = pnand %p810_p1, %p807_p0 }
   0x8   :  { %815 = shalt.err (!%p812_p2)
}
   0x9   :  { %s816_s14 = scalar_lea.vmem %s46_s22, 1024  ;;  %p821_p4 = scmp.lt.s32.totalorder %s46_s22, %s46_s22 }
   0xa   :  { %p817_p3 = scmp.ne.s32.totalorder %s46_s22, %s816_s14  ;;  %p822_p5 = scmp.lt.s32.totalorder %s816_s14, %s816_s14 }
   0xc   :  { %p823_p6 = por %p822_p5, %p821_p4 }
   0xe   :  { %p824_p7 = pnand %p823_p6, %p817_p3 }
  0x10   :  { %827 = shalt.err (!%p824_p7)
}
  0x11   :  { %s878_s15 = smov 64   ;;  %s879_s16 = smov 4  }
  0x12   :  { %51 = dma.hbm_to_vmem [thread:$0]  %s1101_s5, 1024, %s46_s22, [#allocation5], %s878_s15, %s878_s15, %s879_s16  }
  0x13   :  { %s828_s21 = scalar_lea.hbm %s1098_s2, 1024 }
  0x14   :  { %p829_p8 = scmp.ne.s32.totalorder %s1098_s2, %s828_s21  ;;  %p832_p9 = scmp.lt.u32.totalorder %s828_s21, %s1098_s2 }
  0x16   :  { %p834_p10 = pnand %p832_p9, %p829_p8 }
  0x18   :  { %837 = shalt.err (!%p834_p10)
}
  0x19   :  { %s838_s28 = scalar_lea.vmem %s949_s24, 1024  ;;  %p843_p12 = scmp.lt.s32.totalorder %s949_s24, %s949_s24 }
  0x1a   :  { %p839_p11 = scmp.ne.s32.totalorder %s949_s24, %s838_s28  ;;  %p844_p13 = scmp.lt.s32.totalorder %s838_s28, %s838_s28 }
  0x1c   :  { %p845_p0 = por %p844_p13, %p843_p12 }
  0x1e   :  { %p846_p1 = pnand %p845_p0, %p839_p11 }
  0x20   :  { %849 = shalt.err (!%p846_p1)
}
  0x21   :  { %35 = dma.hbm_to_vmem [thread:$0]  %s1098_s2, 1024, %s949_s24, [#allocation3], %s878_s15, %s878_s15, %s879_s16  }
  0x22   :  { %s880_s29 = smov [#allocation6]   ;;  %s850_s17 = scalar_lea.hbm %s1103_s7, 1024 }
  0x23   :  { %s59_s30 = sshll.u32 %s880_s29, 4  ;;  %p851_p2 = scmp.ne.s32.totalorder %s1103_s7, %s850_s17  ;;  %s60_s30 = int_to_ptr.vmem [resolvable:$true] %s59_s30 }
  0x24   :  { %p854_p3 = scmp.lt.u32.totalorder %s850_s17, %s1103_s7 }
  0x26   :  { %p856_p4 = pnand %p854_p3, %p851_p2 }
  0x28   :  { %859 = shalt.err (!%p856_p4)
}
  0x29   :  { %s860_s23 = scalar_lea.vmem %s60_s30, 1024  ;;  %p865_p6 = scmp.lt.s32.totalorder %s60_s30, %s60_s30 }
  0x2a   :  { %p861_p5 = scmp.ne.s32.totalorder %s60_s30, %s860_s23  ;;  %p866_p7 = scmp.lt.s32.totalorder %s860_s23, %s860_s23 }
  0x2c   :  { %p867_p8 = por %p866_p7, %p865_p6 }
  0x2e   :  { %p868_p9 = pnand %p867_p8, %p861_p5 }
  0x30   :  { %871 = shalt.err (!%p868_p9)
}
  0x31   :  { %65 = dma.hbm_to_vmem [thread:$0]  %s1103_s7, 1024, %s60_s30, [#allocation5], %s878_s15, %s878_s15, %s879_s16  }
  0x32   :  { %872 = dma.done.wait [#allocation3], 1024  }
  0x33   :  { %873 = vsyncadd [#allocation3], 4294966272 }
  0x34   :  { %874 = dma.done.wait [#allocation5], 2048  }
  0x35   :  { %875 = vsyncadd [#allocation5], 4294965248  ;;  %v881_v0 = vmov 0.0   ;;  %vm882_vm0 = vmmov 0   ;;  %v883_v1 = vmov 0   ;;  %v774_v2 = vld [vmem:[#allocation2] sm:$0xff]   ;;  %v93_v33 = vlaneseq }
  0x36   :  { %679 = vmatprep.subr.bf16.mxu0 %v881_v0  ;;  %695 = vmatprep.mubr.msk.bf16.mxu0 %vm882_vm0, %v881_v0  ;;  %v775_v3 = vld [vmem:[#allocation2 + $0x8] sm:$0xff]   ;;  %v776_v4 = vld [vmem:[#allocation2 + $0x10] sm:$0xff]   ;;  %v83_v5 = vld [vmem:[%s1096_s0] sm:$0xff] }
  0x37   :  { %767 = vset.pattern.permute.xlu0 %v883_v1  ;;  %773 = vset.pattern.permute.xlu1 %v883_v1  ;;  %vm85_vm1 = vcmp.eq.s32.totalorder %v83_v5, 0  ;;  %vm98_vm2 = vcmp.eq.s32.totalorder %v83_v5, 1  ;;  %vm112_vm3 = vcmp.eq.s32.totalorder %v83_v5, 2  ;;  %v782_v6 = vld [vmem:[#allocation4] sm:$0xff]   ;;  %v777_v7 = vld [vmem:[#allocation2 + $0x18] sm:$0xff]   ;;  %vm126_vm4 = vcmp.eq.s32.totalorder %v83_v5, 3 }
  0x38   :  { %699 = vmatprep.subr.bf16.mxu1 %v881_v0  ;;  %715 = vmatprep.mubr.msk.bf16.mxu1 %vm882_vm0, %v881_v0  ;;  %v603_v8 = vsel %vm85_vm1, 1.0, %v881_v0  ;;  %v604_v9 = vsel %vm98_vm2, 1.0, %v881_v0  ;;  %v606_v11 = vsel %vm126_vm4, 1.0, %v881_v0  ;;  %v783_v12 = vld [vmem:[#allocation4 + $0x8] sm:$0xff]   ;;  %v778_v13 = vld [vmem:[#allocation2 + $0x20] sm:$0xff]   ;;  %v605_v14 = vsel %vm112_vm3, 1.0, %v881_v0 }
  0x39   :  { %680 = vmatpush3.bf16.msra.mxu0 %v774_v2  ;;  %v768_v10 = vpack.i.bf16 %v604_v9, %v603_v8  ;;  %700 = vmatpush3.bf16.msra.mxu1 %v782_v6  ;;  %v784_v15 = vld [vmem:[#allocation4 + $0x10] sm:$0xff]   ;;  %v779_v16 = vld [vmem:[#allocation2 + $0x28] sm:$0xff]   ;;  %v785_v17 = vld [vmem:[#allocation4 + $0x18] sm:$0xff]   ;;  %v94_v34 = vshrl.u32 %v93_v33, 7 }
  0x3a   :  { %681 = vmatprep.subr.bf16.mxu0 %v881_v0  ;;  %131 = vperm.xlu1 %773, %v606_v11   ;;  %v780_v18 = vld [vmem:[#allocation2 + $0x30] sm:$0xff]   ;;  %v786_v19 = vld [vmem:[#allocation4 + $0x20] sm:$0xff]   ;;  %v781_v20 = vld [vmem:[#allocation2 + $0x38] sm:$0xff]  }
  0x3b   :  { %701 = vmatprep.subr.bf16.mxu1 %v881_v0  ;;  %769 = vperm.xlu0 %767, %v768_v10   ;;  %v82_v21 = vld [vmem:[%s1097_s1] sm:$0xff]  ;;  %v787_v22 = vld [vmem:[#allocation4 + $0x28] sm:$0xff]   ;;  %v788_v24 = vld [vmem:[#allocation4 + $0x30] sm:$0xff]   ;;  %v95_v35 = vsub.s32 0, %v94_v34  ;;  %v108_v37 = vsub.s32 1, %v94_v34  ;;  %v122_v43 = vsub.s32 2, %v94_v34 }
  0x3c   :  { %v140_v23 = vpack.c.bf16 %v82_v21, %v82_v21  ;;  %v789_v25 = vld [vmem:[#allocation4 + $0x38] sm:$0xff]   ;;  %v790_v26 = vld [vmem:[#allocation6] sm:$0xff]   ;;  %v791_v27 = vld [vmem:[#allocation6 + $0x8] sm:$0xff]   ;;  %v136_v47 = vsub.s32 3, %v94_v34 }
  0x3d   :  { %682 = vmatpush3.bf16.msra.mxu0 %v775_v3  ;;  %702 = vmatpush3.bf16.msra.mxu1 %v783_v12  ;;  %v792_v28 = vld [vmem:[#allocation6 + $0x10] sm:$0xff]   ;;  %v793_v29 = vld [vmem:[#allocation6 + $0x18] sm:$0xff]   ;;  %v794_v30 = vld [vmem:[#allocation6 + $0x20] sm:$0xff]  }
  0x3e   :  { %683 = vmatprep.subr.bf16.mxu0 %v881_v0  ;;  %703 = vmatprep.subr.bf16.mxu1 %v881_v0  ;;  %v795_v31 = vld [vmem:[#allocation6 + $0x28] sm:$0xff]   ;;  %v796_v32 = vld [vmem:[#allocation6 + $0x30] sm:$0xff]   ;;  %v84_v36 = vld [vmem:[%s1099_s3] sm:$0xff] }
  0x3f   :  { %117 = vperm.xlu0 %767, %v605_v14   ;;  %v96_v39 = vrot.slane %v84_v36, %v95_v35  ;;  %v109_v40 = vrot.slane %v84_v36, %v108_v37  ;;  %v123_v46 = vrot.slane %v84_v36, %v122_v43  ;;  %v137_v51 = vrot.slane %v84_v36, %v136_v47  ;;  %v615_v57 = vld [vmem:[%s1100_s4] ss:$0 sm:$0xff]  ;;  %v797_v2 = vld [vmem:[#allocation6 + $0x38] sm:$0xff]   ;;  %v800_v5 = vld [vmem:[%s1105_s9 + $0x10] sm:$0xff]  }
  0x40   :  { %v798_v3 = vld [vmem:[%s1105_s9] sm:$0xff]   ;;  %v801_v6 = vld [vmem:[%s1105_s9 + $0x18] sm:$0xff]   ;;  %v803_v8 = vld [vmem:[%s1105_s9 + $0x28] sm:$0xff]  }
  0x41   :  { %684 = vmatpush3.bf16.msra.mxu0 %v776_v4  ;;  %704 = vmatpush3.bf16.msra.mxu1 %v784_v15  ;;  %v799_v4 = vld [vmem:[%s1105_s9 + $0x8] sm:$0xff]   ;;  %v616_v9 = vld [vmem:[%s1102_s6] ss:$0 sm:$0xff] }
  0x42   :  { %685 = vmatprep.subr.bf16.mxu0 %v881_v0  ;;  %705 = vmatprep.subr.bf16.mxu1 %v881_v0 }
  0x45   :  { %686 = vmatpush3.bf16.msra.mxu0 %v777_v7  ;;  %706 = vmatpush3.bf16.msra.mxu1 %v785_v17  ;;  %v802_v7 = vld [vmem:[%s1105_s9 + $0x20] sm:$0xff]   ;;  %v805_v17 = vld [vmem:[%s1105_s9 + $0x38] sm:$0xff]  }
  0x46   :  { %687 = vmatprep.subr.bf16.mxu0 %v881_v0  ;;  %707 = vmatprep.subr.bf16.mxu1 %v881_v0 }
  0x49   :  { %688 = vmatpush3.bf16.msra.mxu0 %v778_v13  ;;  %708 = vmatpush3.bf16.msra.mxu1 %v786_v19 }
  0x4a   :  { %689 = vmatprep.subr.bf16.mxu0 %v881_v0  ;;  %709 = vmatprep.subr.bf16.mxu1 %v881_v0 }
  0x4d   :  { %690 = vmatpush3.bf16.msra.mxu0 %v779_v16  ;;  %710 = vmatpush3.bf16.msra.mxu1 %v787_v22  ;;  %v804_v16 = vld [vmem:[%s1105_s9 + $0x30] sm:$0xff]  }
  0x4e   :  { %691 = vmatprep.subr.bf16.mxu0 %v881_v0  ;;  %711 = vmatprep.subr.bf16.mxu1 %v881_v0 }
  0x51   :  { %692 = vmatpush3.bf16.msra.mxu0 %v780_v18  ;;  %712 = vmatpush3.bf16.msra.mxu1 %v788_v24  ;;  %v625_v18 = vld [vmem:[%s1104_s8] ss:$0 sm:$0xff] }
  0x52   :  { %693 = vmatprep.subr.bf16.mxu0 %v881_v0  ;;  %713 = vmatprep.subr.bf16.mxu1 %v881_v0 }
  0x55   :  { %694 = vmatpush3.bf16.msra.mxu0 %v781_v20  ;;  %714 = vmatpush3.bf16.msra.mxu1 %v789_v25 }
  0x56   :  { %719 = vmatprep.subr.bf16.mxu0 %v881_v0  ;;  %739 = vmatprep.subr.bf16.mxu1 %v881_v0 }
  0x58   :  { %696 = vmatmul.mubr.bf16.vlgmr.msra.gmra.mrb[0].mxu0 %v140_v23 }
  0x59   :  { %735 = vmatprep.mubr.msk.bf16.mxu0 %vm882_vm0, %v881_v0  ;;  %720 = vmatpush3.bf16.msra.mxu0 %v790_v26 }
  0x5a   :  { %721 = vmatprep.subr.bf16.mxu0 %v881_v0 }
  0x5d   :  { %722 = vmatpush3.bf16.msra.mxu0 %v791_v27 }
  0x5e   :  { %723 = vmatprep.subr.bf16.mxu0 %v881_v0 }
  0x61   :  { %724 = vmatpush3.bf16.msra.mxu0 %v792_v28 }
  0x62   :  { %725 = vmatprep.subr.bf16.mxu0 %v881_v0 }
  0x65   :  { %726 = vmatpush3.bf16.msra.mxu0 %v793_v29 }
  0x66   :  { %727 = vmatprep.subr.bf16.mxu0 %v881_v0 }
  0x69   :  { %728 = vmatpush3.bf16.msra.mxu0 %v794_v30 }
  0x6a   :  { %729 = vmatprep.subr.bf16.mxu0 %v881_v0 }
  0x6d   :  { %730 = vmatpush3.bf16.msra.mxu0 %v795_v31 }
  0x6e   :  { %731 = vmatprep.subr.bf16.mxu0 %v881_v0 }
  0x71   :  { %732 = vmatpush3.bf16.msra.mxu0 %v796_v32 }
  0x72   :  { %733 = vmatprep.subr.bf16.mxu0 %v881_v0 }
  0x75   :  { %734 = vmatpush3.bf16.msra.mxu0 %v797_v2 }
  0xb9   :  { %v132_v52 = vpop.permute.xlu1 %131 }
  0xba   :  { %v770_v38 = vpop.permute.xlu0 %769  ;;  %v138_v54 = vmul.f32 %v137_v51, %v132_v52 }
  0xbb   :  { %v772_v41 = vunpack.i.h.bf16 %v770_v38  ;;  %v771_v42 = vunpack.i.l.bf16 %v770_v38 }
  0xbd   :  { %v110_v44 = vmul.f32 %v772_v41, %v109_v40  ;;  %v97_v45 = vmul.f32 %v771_v42, %v96_v39 }
  0xbe   :  { %v118_v48 = vpop.permute.xlu0 %117 }
  0xbf   :  { %v111_v49 = vadd.f32 %v110_v44, %v97_v45  ;;  %v124_v50 = vmul.f32 %v123_v46, %v118_v48 }
  0xc1   :  { %v125_v53 = vadd.f32 %v124_v50, %v111_v49 }
  0xc3   :  { %v139_v55 = vadd.f32 %v138_v54, %v125_v53 }
 0x12b   :  { %v239_v56 = vpop.f32.mrb[0].mxu0 }
 0x12c   :  { %v240_v58 = vadd.f32 %v239_v56, %v139_v55  ;;  %v697_v59 = vpop.f32.mrb[1].mxu0 }
 0x12d   :  { %v242_v60 = vpop.f32.mrb[2].mxu0 }
 0x12e   :  { %v252_v61 = vadd.f32 %v615_v57, %v240_v58  ;;  %v698_v62 = vpop.f32.mrb[3].mxu0 }
 0x130   :  { %v253_v63 = vmax.f32 %v252_v61, 0.0 }
 0x132   :  { %v254_v1 = vpack.c.bf16 %v253_v63, %v253_v63 }
 0x134   :  { %716 = vmatmul.mubr.bf16.vlgmr.msra.gmra.mrb[0].mxu1 %v254_v1 }
 0x135   :  { %755 = vmatprep.mubr.msk.bf16.mxu1 %vm882_vm0, %v881_v0  ;;  %740 = vmatpush3.bf16.msra.mxu1 %v798_v3 }
 0x136   :  { %741 = vmatprep.subr.bf16.mxu1 %v881_v0 }
 0x139   :  { %742 = vmatpush3.bf16.msra.mxu1 %v799_v4 }
 0x13a   :  { %743 = vmatprep.subr.bf16.mxu1 %v881_v0 }
 0x13d   :  { %744 = vmatpush3.bf16.msra.mxu1 %v800_v5 }
 0x13e   :  { %745 = vmatprep.subr.bf16.mxu1 %v881_v0 }
 0x141   :  { %746 = vmatpush3.bf16.msra.mxu1 %v801_v6 }
 0x142   :  { %747 = vmatprep.subr.bf16.mxu1 %v881_v0 }
 0x145   :  { %748 = vmatpush3.bf16.msra.mxu1 %v802_v7 }
 0x146   :  { %749 = vmatprep.subr.bf16.mxu1 %v881_v0 }
 0x149   :  { %750 = vmatpush3.bf16.msra.mxu1 %v803_v8 }
 0x14a   :  { %751 = vmatprep.subr.bf16.mxu1 %v881_v0 }
 0x14d   :  { %752 = vmatpush3.bf16.msra.mxu1 %v804_v16 }
 0x14e   :  { %753 = vmatprep.subr.bf16.mxu1 %v881_v0  ;;  %v634_v0 = vld [vmem:[%s1106_s10] ss:$0 sm:$0xff] }
 0x151   :  { %754 = vmatpush3.bf16.msra.mxu1 %v805_v17 }
 0x207   :  { %v360_v10 = vpop.f32.mrb[0].mxu1 }
 0x208   :  { %v361_v11 = vadd.f32 %v616_v9, %v360_v10  ;;  %v717_v12 = vpop.f32.mrb[1].mxu1 }
 0x209   :  { %v363_v13 = vpop.f32.mrb[2].mxu1 }
 0x20a   :  { %v366_v14 = vpack.c.bf16 %v361_v11, %v361_v11  ;;  %591 = vst [vmem:[%s1107_s11] sm:$0xff] %v361_v11  ;;  %v718_v15 = vpop.f32.mrb[3].mxu1 }
 0x20c   :  { %736 = vmatmul.mubr.bf16.vlgmr.msra.gmra.mrb[4].mxu0 %v366_v14 }
 0x2df   :  { %v472_v19 = vpop.f32.mrb[4].mxu0 }
 0x2e0   :  { %v473_v20 = vadd.f32 %v625_v18, %v472_v19  ;;  %v737_v21 = vpop.f32.mrb[5].mxu0 }
 0x2e1   :  { %v475_v22 = vpop.f32.mrb[6].mxu0 }
 0x2e2   :  { %v478_v23 = vmax.f32 %v473_v20, 0.0  ;;  %v738_v24 = vpop.f32.mrb[7].mxu0 }
 0x2e4   :  { %v479_v25 = vpack.c.bf16 %v478_v23, %v478_v23 }
 0x2e6   :  { %756 = vmatmul.mubr.bf16.vlgmr.msra.gmra.mrb[4].mxu1 %v479_v25 }
 0x3b9   :  { %v585_v26 = vpop.f32.mrb[4].mxu1 }
 0x3ba   :  { %v586_v27 = vadd.f32 %v634_v0, %v585_v26  ;;  %v757_v28 = vpop.f32.mrb[5].mxu1 }
 0x3bb   :  { %v588_v29 = vpop.f32.mrb[6].mxu1 }
 0x3bc   :  { %592 = vst [vmem:[%s1108_s12] sm:$0xff] %v586_v27  ;;  %v758_v30 = vpop.f32.mrb[7].mxu1 }
 0x3bd   :  { %601 = vsyncpa [#allocation3], 1 }
 0x3be   :  { %602 = vsyncpa [#allocation5], 1 }

</bundles_post_ra>
